<compile_context>
chip_gen: v7x
topology: tpu7x:2x2x1
jax: 0.10.0
libtpu: 0.0.40
codegen_flags: <defaults>
</compile_context>

<pallas_src>
import jax
import jax.numpy as jnp
from jax import lax
from jax.experimental import pallas as pl
from jax.experimental.pallas import tpu as pltpu


def _round_up(x, m):
    return (x + m - 1) // m * m


# --------------------------------------------------------------------------
# Pallas kernel: one (batch-tile, direction, time-chunk) grid step
# --------------------------------------------------------------------------
def pblstm_kernel(x_ref, lens_ref, wih_ref, whh_ref, b_ref,
                  out_ref, g_ref, h_ref, c_ref):
    """Shapes (all padded/aligned by the wrapper):

      x_ref   : (Tc, TB, Fp)    compute dtype, time-major chunk (original order)
      lens_ref: (TB, 1)         int32 valid lengths (0 for padded batch rows)
      wih_ref : (1, Fp, 4Hp)    compute dtype, this direction, gates [i,f,o,g]
      whh_ref : (1, Hp, 4Hp)    compute dtype, same gate order
      b_ref   : (1, 1, 4Hp)     float32 (bias_ih + bias_hh folded)
      out_ref : (Tc, TB, Hp)    output chunk for this direction
      g_ref   : (Tc, TB, 4Hp)   f32 scratch — hoisted input projection
      h_ref/c_ref : (TB, Hp)    f32 scratch — recurrent state (persists across
                                 the chunk grid axis)
    """
    Tc, TB, Fp = x_ref.shape
    Hp = whh_ref.shape[1]
    cd = x_ref.dtype

    d = pl.program_id(1)                   # 0 = forward, 1 = backward
    c = pl.program_id(2)                   # chunk step in processing order
    nC = pl.num_programs(2)
    cc = c + d * (nC - 1 - 2 * c)          # chunk index in original time order

    # New (batch-tile, direction) column: reset the recurrent state.
    @pl.when(c == 0)
    def _():
        h_ref[...] = jnp.zeros_like(h_ref)
        c_ref[...] = jnp.zeros_like(c_ref)

    # Hoisted per-chunk input projection: one big MXU matmul (f32 accumulate).
    x_flat = x_ref[...].reshape(Tc * TB, Fp)
    g_ref[...] = (jnp.dot(x_flat, wih_ref[0],
                          preferred_element_type=jnp.float32)
                  + b_ref[0]).reshape(Tc, TB, 4 * Hp)

    w_hh = whh_ref[0]
    lens = lens_ref[...]                   # (TB, 1) int32
    t_base = cc * Tc

    def body(t, carry):
        h, cs = carry
        # Within-chunk index in original time order (reversed for backward).
        tt = jnp.where(d == 0, t, Tc - 1 - t)
        tg = t_base + tt                   # global (original) time index

        gates = g_ref[tt] + jnp.dot(h.astype(cd), w_hh,
                                    preferred_element_type=jnp.float32)
        ifo = jax.nn.sigmoid(gates[:, 0:3 * Hp])   # one contiguous EUP slab
        g_in = jnp.tanh(gates[:, 3 * Hp:4 * Hp])
        i_g = ifo[:, 0:Hp]
        f_g = ifo[:, Hp:2 * Hp]
        o_g = ifo[:, 2 * Hp:3 * Hp]
        c_new = f_g * cs + i_g * g_in
        h_new = o_g * jnp.tanh(c_new)

        valid = tg < lens                  # packed-sequence mask, (TB, 1)
        h = jnp.where(valid, h_new, h)
        cs = jnp.where(valid, c_new, cs)
        out_ref[tt] = jnp.where(valid, h_new, 0.0).astype(out_ref.dtype)
        return (h, cs)

    # unroll=1: fwd/bwd already run in separate grid steps; keeping the loop
    # rolled minimizes carried vreg pressure on the serial path.
    hN, cN = lax.fori_loop(0, Tc, body, (h_ref[...], c_ref[...]))
    h_ref[...] = hN
    c_ref[...] = cN


# --------------------------------------------------------------------------
# Parameter prep (gate reorder + padding + dtype)
# --------------------------------------------------------------------------
def _prep_dir_weights(w_ih, w_hh, b, H, Hp, Fp, cd):
    """Reorder PyTorch gate blocks (i,f,g,o) -> (i,f,o,g) and pad to lanes."""
    def reorder_pad(m, rows_to):
        blocks = [m[:, 0 * H:1 * H], m[:, 1 * H:2 * H],
                  m[:, 3 * H:4 * H], m[:, 2 * H:3 * H]]      # i, f, o, g
        blocks = [jnp.pad(blk, ((0, rows_to - m.shape[0]), (0, Hp - H)))
                  for blk in blocks]
        return jnp.concatenate(blocks, axis=1)
    w_ih_p = reorder_pad(w_ih, Fp).astype(cd)                 # (Fp, 4Hp)
    w_hh_p = reorder_pad(w_hh, Hp).astype(cd)                 # (Hp, 4Hp)
    b2 = b.reshape(1, 4 * H)
    bb = [b2[:, 0 * H:1 * H], b2[:, 1 * H:2 * H],
          b2[:, 3 * H:4 * H], b2[:, 2 * H:3 * H]]
    b_p = jnp.concatenate([jnp.pad(blk, ((0, 0), (0, Hp - H))) for blk in bb],
                          axis=1).astype(jnp.float32)         # (1, 4Hp)
    return w_ih_p, w_hh_p, b_p


def init_params(key, input_size, hidden_size):
    """Deterministic uniform(-0.1, 0.1) init, matching the module's init.

    PyTorch stores weight_ih_l0 as (4H, 2*input_size) and weight_hh_l0 as
    (4H, H); we pre-transpose so the kernel can do x @ W directly, and fold
    bias_ih + bias_hh into a single bias per direction. Gate order: i, f, g, o.
    """
    in2 = 2 * input_size
    H = hidden_size
    ks = jax.random.split(key, 8)
    u = lambda k, shp: jax.random.uniform(k, shp, jnp.float32, -0.1, 0.1)
    return {
        "w_ih_f": u(ks[0], (4 * H, in2)).T,                  # (2F, 4H)
        "w_hh_f": u(ks[1], (4 * H, H)).T,                    # (H, 4H)
        "b_f": (u(ks[2], (4 * H,)) + u(ks[3], (4 * H,))).reshape(1, 4 * H),
        "w_ih_b": u(ks[4], (4 * H, in2)).T,
        "w_hh_b": u(ks[5], (4 * H, H)).T,
        "b_b": (u(ks[6], (4 * H,)) + u(ks[7], (4 * H,))).reshape(1, 4 * H),
    }


# --------------------------------------------------------------------------
# Wrapper
# --------------------------------------------------------------------------
def pblstm_forward(x, x_lens, params, *, use_bf16=False, batch_tile=None,
                   time_chunk=32, out_dtype=None):
    """x: (B, T, F) float32 padded input; x_lens: (B,) int32.

    Returns (out, new_lens) with out: (B, T//2, 2H) — padded equivalent of the
    packed sequence the PyTorch module returns (pad value = 0).
    """
    B, T, F = x.shape
    T2 = T // 2
    F2 = 2 * F
    H = params["w_hh_f"].shape[0]

    cd = jnp.bfloat16 if use_bf16 else jnp.float32   # bf16 is fine on v5e too
    od = jnp.float32 if out_dtype is None else jnp.dtype(out_dtype)
    Hp = _round_up(H, 128)                       # lane-aligned hidden
    Fp = _round_up(F2, 128)                      # lane-aligned input features
    TB = batch_tile if batch_tile is not None else min(_round_up(B, 8), 32)
    TB = _round_up(TB, 8)                        # sublane-aligned batch tile
    Bp = _round_up(B, TB)
    Tc = max(1, min(time_chunk, T2))             # time-chunk length
    T2p = _round_up(T2, Tc)
    nC = T2p // Tc

    # trunc_reshape: drop odd tail frame, fold frame pairs into features.
    x = x[:, :T2 * 2, :].reshape(B, T2, F2)
    # The module does torch.clamp(x_lens, max=T2) (it does NOT halve lengths).
    x_lens = jnp.minimum(x_lens.astype(jnp.int32), T2)
    # TODO(synk): lstm_locked_dropout is training-only stochastic masking and is
    # disabled in this forward (locked_dropout=False / eval), so it is omitted.

    # Cast first so the fused cast+transpose+pad moves compute-dtype bytes only.
    x_tm = jnp.transpose(x.astype(cd), (1, 0, 2))               # (T2, B, F2)
    x_tm = jnp.pad(x_tm, ((0, T2p - T2), (0, Bp - B), (0, Fp - F2)))
    lens2d = jnp.pad(x_lens, (0, Bp - B)).reshape(Bp, 1)        # (Bp, 1)

    wih_f, whh_f, b_f = _prep_dir_weights(params["w_ih_f"], params["w_hh_f"],
                                          params["b_f"], H, Hp, Fp, cd)
    wih_b, whh_b, b_b = _prep_dir_weights(params["w_ih_b"], params["w_hh_b"],
                                          params["b_b"], H, Hp, Fp, cd)
    wih = jnp.stack([wih_f, wih_b])              # (2, Fp, 4Hp)
    whh = jnp.stack([whh_f, whh_b])              # (2, Hp, 4Hp)
    bias = jnp.stack([b_f, b_b])                 # (2, 1, 4Hp)

    # ---- VMEM budget: 2 pipeline buffers per input/output + scratch + the
    # projection matmul temporary.  Cap at 56 MiB so it is safe on v7x
    # (64 MiB/TC) while leaving headroom; v5e/v6e (128 MiB) are never the
    # binding constraint for these chunked tiles.
    isz = jnp.dtype(cd).itemsize
    osz = jnp.dtype(od).itemsize
    x_blk = Tc * TB * Fp * isz
    o_blk = Tc * TB * Hp * osz
    w_blk = (Fp * 4 * Hp + Hp * 4 * Hp) * isz + 4 * Hp * 4
    lens_blk = TB * 128 * 4                      # lane-padded (TB, 1) tile
    scratch = Tc * TB * 4 * Hp * 4 + 2 * TB * Hp * 4
    proj_tmp = Tc * TB * 4 * Hp * 4
    est = 2 * (x_blk + o_blk + w_blk + lens_blk) + scratch + proj_tmp
    vmem_limit = int(min(max(int(est * 1.5), 24 * 2**20), 56 * 2**20))

    # ---- advisory cost estimate for XLA's scheduler
    flops = 2 * 2 * Bp * T2p * (Fp + Hp) * 4 * Hp        # 2 dirs, proj + rec
    transc = 2 * Bp * T2p * 5 * Hp                       # 3 sigmoid + 2 tanh
    bytes_acc = (2 * Bp * T2p * Fp * isz                 # x read per direction
                 + Bp * T2p * 2 * Hp * osz               # output write
                 + 2 * (Fp + Hp) * 4 * Hp * isz + 2 * 4 * Hp * 4 + Bp * 4)
    cost = pl.CostEstimate(flops=int(flops), transcendentals=int(transc),
                           bytes_accessed=int(bytes_acc))

    # Chunk index in original time order: forward walks 0..nC-1,
    # backward walks nC-1..0.
    def time_block(d, c):
        return c + d * (nC - 1 - 2 * c)

    out = pl.pallas_call(
        pblstm_kernel,
        out_shape=jax.ShapeDtypeStruct((T2p, Bp, 2 * Hp), od),
        grid_spec=pltpu.PrefetchScalarGridSpec(
            num_scalar_prefetch=0,
            grid=(Bp // TB, 2, nC),
            in_specs=[
                pl.BlockSpec((Tc, TB, Fp),
                             lambda b, d, c: (time_block(d, c), b, 0)),   # x
                pl.BlockSpec((TB, 1), lambda b, d, c: (b, 0)),            # lens
                pl.BlockSpec((1, Fp, 4 * Hp), lambda b, d, c: (d, 0, 0)),  # wih
                pl.BlockSpec((1, Hp, 4 * Hp), lambda b, d, c: (d, 0, 0)),  # whh
                pl.BlockSpec((1, 1, 4 * Hp), lambda b, d, c: (d, 0, 0)),   # b
            ],
            # last block index d selects the forward/backward Hp-wide half.
            out_specs=pl.BlockSpec((Tc, TB, Hp),
                                   lambda b, d, c: (time_block(d, c), b, d)),
            scratch_shapes=[pltpu.VMEM((Tc, TB, 4 * Hp), jnp.float32),
                            pltpu.VMEM((TB, Hp), jnp.float32),
                            pltpu.VMEM((TB, Hp), jnp.float32)],
        ),
        compiler_params=pltpu.CompilerParams(
            dimension_semantics=("parallel", "parallel", "arbitrary"),
            vmem_limit_bytes=vmem_limit,
        ),
        cost_estimate=cost,
    )(x_tm, lens2d, wih, whh, bias)

    # (T2p, Bp, 2Hp) -> (B, T2, 2H); last dim = [forward H | backward H]
    out = out[:T2, :B]
    if Hp != H:
        out = jnp.concatenate([out[..., :H], out[..., Hp:Hp + H]], axis=-1)
    out = jnp.transpose(out, (1, 0, 2))
    return out, x_lens


# --------------------------------------------------------------------------
# Pure-JAX reference (no Pallas) for correctness checking
# --------------------------------------------------------------------------
def _lstm_cell_ref(x_t, h, c, w_ih, w_hh, b, H):
    gates = (jnp.dot(x_t, w_ih, preferred_element_type=jnp.float32)
             + jnp.dot(h, w_hh, preferred_element_type=jnp.float32) + b)
    i = jax.nn.sigmoid(gates[:, 0 * H:1 * H])
    f = jax.nn.sigmoid(gates[:, 1 * H:2 * H])
    g = jnp.tanh(gates[:, 2 * H:3 * H])
    o = jax.nn.sigmoid(gates[:, 3 * H:4 * H])
    c_new = f * c + i * g
    h_new = o * jnp.tanh(c_new)
    return h_new, c_new


def pblstm_reference(x, x_lens, params):
    B, T, F = x.shape
    T2 = T // 2
    x = x[:, :T2 * 2, :].reshape(B, T2, 2 * F)
    lens = jnp.minimum(x_lens.astype(jnp.int32), T2).reshape(B, 1)
    H = params["w_hh_f"].shape[0]

    h_f = jnp.zeros((B, H), jnp.float32); c_f = jnp.zeros((B, H), jnp.float32)
    h_b = jnp.zeros((B, H), jnp.float32); c_b = jnp.zeros((B, H), jnp.float32)
    out_f = []
    out_b = [None] * T2
    for t in range(T2):
        hn, cn = _lstm_cell_ref(x[:, t], h_f, c_f, params["w_ih_f"],
                                params["w_hh_f"], params["b_f"], H)
        m = t < lens
        h_f = jnp.where(m, hn, h_f); c_f = jnp.where(m, cn, c_f)
        out_f.append(jnp.where(m, hn, 0.0))
    for t in range(T2 - 1, -1, -1):
        hn, cn = _lstm_cell_ref(x[:, t], h_b, c_b, params["w_ih_b"],
                                params["w_hh_b"], params["b_b"], H)
        m = t < lens
        h_b = jnp.where(m, hn, h_b); c_b = jnp.where(m, cn, c_b)
        out_b[t] = jnp.where(m, hn, 0.0)
    of = jnp.stack(out_f, axis=1)
    ob = jnp.stack(out_b, axis=1)
    return jnp.concatenate([of, ob], axis=-1), lens.reshape(-1)


if __name__ == "__main__":
    key = jax.random.PRNGKey(0)
    k_x, k_p = jax.random.split(key)

    B, T, input_size, hidden_size = 2, 8, 16, 32
    x = jax.random.normal(k_x, (B, T, input_size), jnp.float32)
    x_lens = jnp.array([8, 3], jnp.int32)   # second sequence exercises masking

    params = init_params(k_p, input_size, hidden_size)

    ref, ref_lens = pblstm_reference(x, x_lens, params)

    # f32 path: exact match against the reference.
    out, out_lens = pblstm_forward(x, x_lens, params, use_bf16=False)
    out = jax.block_until_ready(out)
    assert out.shape == (B, T // 2, 2 * hidden_size), out.shape
    assert jnp.allclose(out, ref, atol=1e-5, rtol=1e-5), "f32 mismatch vs reference"
    assert jnp.array_equal(out_lens, ref_lens)

    # bf16 activations/weights + bf16 output (MXU / VMEM / HBM optimization,
    # valid on v5e/v6e/v7x; state and gate accumulation stay f32).
    out16, _ = pblstm_forward(x, x_lens, params, use_bf16=True,
                              out_dtype=jnp.bfloat16)
    out16 = jax.block_until_ready(out16)
    assert jnp.allclose(out16.astype(jnp.float32), ref,
                        atol=5e-2, rtol=5e-2), "bf16 mismatch vs reference"

    # exercise multi-chunk / multi-batch-tile path (non-divisible T, small Tc)
    B2, T3 = 11, 22
    x2 = jax.random.normal(k_x, (B2, T3, input_size), jnp.float32)
    l2 = jnp.array([22, 21, 17, 11, 8, 5, 3, 2, 1, 20, 13], jnp.int32)
    ref2, _ = pblstm_reference(x2, l2, params)
    out2, _ = pblstm_forward(x2, l2, params, use_bf16=False,
                             batch_tile=8, time_chunk=4)
    out2 = jax.block_until_ready(out2)
    assert jnp.allclose(out2, ref2, atol=1e-5, rtol=1e-5), "chunked mismatch"

    print("KERNEL_OK")
</pallas_src>

<mosaic_0001>
module attributes {stable_mosaic.version = 11 : i64} {
  func.func @pblstm_kernel(%arg0: i32, %arg1: i32, %arg2: i32, %arg3: memref<4x8x128xf32, #tpu.memory_space<vmem>>, %arg4: memref<8x1xi32, #tpu.memory_space<vmem>>, %arg5: memref<1x128x512xf32, #tpu.memory_space<vmem>>, %arg6: memref<1x128x512xf32, #tpu.memory_space<vmem>>, %arg7: memref<1x1x512xf32, #tpu.memory_space<vmem>>, %arg8: memref<4x8x128xf32, #tpu.memory_space<vmem>>, %arg9: memref<4x8x512xf32, #tpu.memory_space<vmem>>, %arg10: memref<8x128xf32, #tpu.memory_space<vmem>>, %arg11: memref<8x128xf32, #tpu.memory_space<vmem>>) attributes {dimension_semantics = [#tpu.dimension_semantics<parallel>, #tpu.dimension_semantics<parallel>, #tpu.dimension_semantics<arbitrary>], iteration_bounds = array<i64: 1, 2, 1>, scalar_prefetch = 0 : i64, scratch_operands = 3 : i64, tpu.core_type = #tpu.core_type<tc>, window_params = [{transform_indices = @transform_0, window_bounds = array<i64: 4, 8, 128>}, {transform_indices = @transform_1, window_bounds = array<i64: 8, 1>}, {transform_indices = @transform_2, window_bounds = array<i64: 1, 128, 512>}, {transform_indices = @transform_3, window_bounds = array<i64: 1, 128, 512>}, {transform_indices = @transform_4, window_bounds = array<i64: 1, 1, 512>}, {transform_indices = @transform_5, window_bounds = array<i64: 4, 8, 128>}]} {
    %c2_i32 = arith.constant 2 : i32
    %0 = arith.muli %c2_i32, %arg2 : i32
    %c0_i32 = arith.constant 0 : i32
    %1 = arith.subi %c0_i32, %0 : i32
    %2 = arith.muli %arg1, %1 : i32
    %3 = arith.addi %arg2, %2 : i32
    %c0_i32_0 = arith.constant 0 : i32
    %4 = arith.cmpi eq, %arg2, %c0_i32_0 : i32
    %5 = arith.extui %4 : i1 to i32
    %c0_i32_1 = arith.constant 0 : i32
    %6 = arith.cmpi ne, %5, %c0_i32_1 : i32
    scf.if %6 {
      %cst_29 = arith.constant 0.000000e+00 : f32
      %28 = vector.broadcast %cst_29 : f32 to vector<8x128xf32>
      %c0_30 = arith.constant 0 : index
      %c0_31 = arith.constant 0 : index
      %29 = vector.load %arg10[%c0_30, %c0_31] : memref<8x128xf32, #tpu.memory_space<vmem>>, vector<8x128xf32>
      tpu.vector_store %arg10[%c0_30, %c0_31], %28 {strides = array<i32>} : memref<8x128xf32, #tpu.memory_space<vmem>>, vector<8x128xf32>,
      %cst_32 = arith.constant 0.000000e+00 : f32
      %30 = vector.broadcast %cst_32 : f32 to vector<8x128xf32>
      %c0_33 = arith.constant 0 : index
      %c0_34 = arith.constant 0 : index
      %31 = vector.load %arg11[%c0_33, %c0_34] : memref<8x128xf32, #tpu.memory_space<vmem>>, vector<8x128xf32>
      tpu.vector_store %arg11[%c0_33, %c0_34], %30 {strides = array<i32>} : memref<8x128xf32, #tpu.memory_space<vmem>>, vector<8x128xf32>,
    } else {
    }
    %c0 = arith.constant 0 : index
    %c0_2 = arith.constant 0 : index
    %c0_3 = arith.constant 0 : index
    %7 = vector.load %arg3[%c0, %c0_2, %c0_3] : memref<4x8x128xf32, #tpu.memory_space<vmem>>, vector<4x8x128xf32>
    %8 = vector.shape_cast %7 : vector<4x8x128xf32> to vector<32x128xf32>
    %c0_4 = arith.constant 0 : index
    %c0_5 = arith.constant 0 : index
    %c0_6 = arith.constant 0 : index
    %9 = vector.load %arg5[%c0_4, %c0_5, %c0_6] : memref<1x128x512xf32, #tpu.memory_space<vmem>>, vector<1x128x512xf32>
    %10 = vector.shape_cast %9 : vector<1x128x512xf32> to vector<128x512xf32>
    %cst = arith.constant dense<0.000000e+00> : vector<32x512xf32>
    %11 = tpu.matmul %8, %10, %cst {dimension_numbers = #tpu.dot_dimension_numbers<[1], [0], [0], [1], [0, 0, 1, 1], [], []>} : vector<32x128xf32>, vector<128x512xf32>, vector<32x512xf32> -> vector<32x512xf32>
    %c0_7 = arith.constant 0 : index
    %c0_8 = arith.constant 0 : index
    %c0_9 = arith.constant 0 : index
    %12 = vector.load %arg7[%c0_7, %c0_8, %c0_9] : memref<1x1x512xf32, #tpu.memory_space<vmem>>, vector<1x1x512xf32>
    %13 = vector.shape_cast %12 : vector<1x1x512xf32> to vector<1x512xf32>
    %14 = vector.broadcast %13 : vector<1x512xf32> to vector<32x512xf32>
    %15 = arith.addf %11, %14 : vector<32x512xf32>
    %16 = vector.shape_cast %15 : vector<32x512xf32> to vector<4x8x512xf32>
    %c0_10 = arith.constant 0 : index
    %c0_11 = arith.constant 0 : index
    %c0_12 = arith.constant 0 : index
    %17 = vector.load %arg9[%c0_10, %c0_11, %c0_12] : memref<4x8x512xf32, #tpu.memory_space<vmem>>, vector<4x8x512xf32>
    tpu.vector_store %arg9[%c0_10, %c0_11, %c0_12], %16 {strides = array<i32>} : memref<4x8x512xf32, #tpu.memory_space<vmem>>, vector<4x8x512xf32>,
    %c0_13 = arith.constant 0 : index
    %c0_14 = arith.constant 0 : index
    %c0_15 = arith.constant 0 : index
    %18 = vector.load %arg6[%c0_13, %c0_14, %c0_15] : memref<1x128x512xf32, #tpu.memory_space<vmem>>, vector<1x128x512xf32>
    %19 = vector.shape_cast %18 : vector<1x128x512xf32> to vector<128x512xf32>
    %c0_16 = arith.constant 0 : index
    %c0_17 = arith.constant 0 : index
    %20 = vector.load %arg4[%c0_16, %c0_17] : memref<8x1xi32, #tpu.memory_space<vmem>>, vector<8x1xi32>
    %c4_i32 = arith.constant 4 : i32
    %21 = arith.muli %3, %c4_i32 : i32
    %c0_18 = arith.constant 0 : index
    %c0_19 = arith.constant 0 : index
    %22 = vector.load %arg10[%c0_18, %c0_19] : memref<8x128xf32, #tpu.memory_space<vmem>>, vector<8x128xf32>
    %c0_20 = arith.constant 0 : index
    %c0_21 = arith.constant 0 : index
    %23 = vector.load %arg11[%c0_20, %c0_21] : memref<8x128xf32, #tpu.memory_space<vmem>>, vector<8x128xf32>
    %c0_i32_22 = arith.constant 0 : i32
    %c4_i32_23 = arith.constant 4 : i32
    %24 = arith.addi %c0_i32_22, %c4_i32_23 : i32
    %c1_i32 = arith.constant 1 : i32
    %25:2 = scf.for %arg12 = %c0_i32_22 to %24 step %c1_i32 iter_args(%arg13 = %22, %arg14 = %23) -> (vector<8x128xf32>, vector<8x128xf32>)  : i32 {
      %c0_i32_29 = arith.constant 0 : i32
      %28 = arith.cmpi eq, %arg1, %c0_i32_29 : i32
      %c3_i32 = arith.constant 3 : i32
      %29 = arith.subi %c3_i32, %arg12 : i32
      %30 = arith.select %28, %arg12, %29 : i32
      %31 = arith.addi %21, %30 : i32
      %32 = arith.index_cast %30 : i32 to index
      %c0_30 = arith.constant 0 : index
      %c0_31 = arith.constant 0 : index
      %33 = vector.load %arg9[%32, %c0_30, %c0_31] : memref<4x8x512xf32, #tpu.memory_space<vmem>>, vector<1x8x512xf32>
      %34 = vector.shape_cast %33 : vector<1x8x512xf32> to vector<8x512xf32>
      %cst_32 = arith.constant dense<0.000000e+00> : vector<8x512xf32>
      %35 = tpu.matmul %arg13, %19, %cst_32 {dimension_numbers = #tpu.dot_dimension_numbers<[1], [0], [0], [1], [0, 0, 1, 1], [], []>} : vector<8x128xf32>, vector<128x512xf32>, vector<8x512xf32> -> vector<8x512xf32>
      %36 = arith.addf %34, %35 : vector<8x512xf32>
      %37 = vector.extract_strided_slice %36 {offsets = [0, 0], sizes = [8, 384], strides = [1, 1]} : vector<8x512xf32> to vector<8x384xf32>
      %38 = arith.negf %37 : vector<8x384xf32>
      %39 = math.exp %38 : vector<8x384xf32>
      %cst_33 = arith.constant 1.000000e+00 : f32
      %40 = vector.broadcast %cst_33 : f32 to vector<8x384xf32>
      %41 = arith.addf %40, %39 : vector<8x384xf32>
      %42 = arith.divf %40, %41 : vector<8x384xf32>
      %43 = vector.extract_strided_slice %36 {offsets = [0, 384], sizes = [8, 128], strides = [1, 1]} : vector<8x512xf32> to vector<8x128xf32>
      %44 = math.tanh %43 : vector<8x128xf32>
      %45 = vector.extract_strided_slice %42 {offsets = [0, 0], sizes = [8, 128], strides = [1, 1]} : vector<8x384xf32> to vector<8x128xf32>
      %46 = vector.extract_strided_slice %42 {offsets = [0, 128], sizes = [8, 128], strides = [1, 1]} : vector<8x384xf32> to vector<8x128xf32>
      %47 = vector.extract_strided_slice %42 {offsets = [0, 256], sizes = [8, 128], strides = [1, 1]} : vector<8x384xf32> to vector<8x128xf32>
      %48 = arith.mulf %46, %arg14 : vector<8x128xf32>
      %49 = arith.mulf %45, %44 : vector<8x128xf32>
      %50 = arith.addf %48, %49 : vector<8x128xf32>
      %51 = math.tanh %50 : vector<8x128xf32>
      %52 = arith.mulf %47, %51 : vector<8x128xf32>
      %53 = vector.broadcast %31 : i32 to vector<8x1xi32>
      %54 = arith.cmpi slt, %53, %20 : vector<8x1xi32>
      %55 = vector.shape_cast %54 : vector<8x1xi1> to vector<8x1xi1>
      %56 = vector.broadcast %55 : vector<8x1xi1> to vector<8x128xi1>
      %57 = arith.select %56, %52, %arg13 : vector<8x128xi1>, vector<8x128xf32>
      %58 = vector.shape_cast %54 : vector<8x1xi1> to vector<8x1xi1>
      %59 = vector.broadcast %58 : vector<8x1xi1> to vector<8x128xi1>
      %60 = arith.select %59, %50, %arg14 : vector<8x128xi1>, vector<8x128xf32>
      %cst_34 = arith.constant 0.000000e+00 : f32
      %61 = vector.shape_cast %54 : vector<8x1xi1> to vector<8x1xi1>
      %62 = vector.broadcast %61 : vector<8x1xi1> to vector<8x128xi1>
      %63 = vector.broadcast %cst_34 : f32 to vector<8x128xf32>
      %64 = arith.select %62, %52, %63 : vector<8x128xi1>, vector<8x128xf32>
      %65 = arith.index_cast %30 : i32 to index
      %c0_35 = arith.constant 0 : index
      %c0_36 = arith.constant 0 : index
      %66 = vector.load %arg8[%65, %c0_35, %c0_36] : memref<4x8x128xf32, #tpu.memory_space<vmem>>, vector<1x8x128xf32>
      %67 = vector.shape_cast %66 : vector<1x8x128xf32> to vector<8x128xf32>
      %68 = vector.shape_cast %64 : vector<8x128xf32> to vector<1x8x128xf32>
      tpu.vector_store %arg8[%65, %c0_35, %c0_36], %68 {strides = array<i32>} : memref<4x8x128xf32, #tpu.memory_space<vmem>>, vector<1x8x128xf32>,
      scf.yield %57, %60 : vector<8x128xf32>, vector<8x128xf32>
    }
    %c4_i32_24 = arith.constant 4 : i32
    %c0_25 = arith.constant 0 : index
    %c0_26 = arith.constant 0 : index
    %26 = vector.load %arg10[%c0_25, %c0_26] : memref<8x128xf32, #tpu.memory_space<vmem>>, vector<8x128xf32>
    tpu.vector_store %arg10[%c0_25, %c0_26], %25#0 {strides = array<i32>} : memref<8x128xf32, #tpu.memory_space<vmem>>, vector<8x128xf32>,
    %c0_27 = arith.constant 0 : index
    %c0_28 = arith.constant 0 : index
    %27 = vector.load %arg11[%c0_27, %c0_28] : memref<8x128xf32, #tpu.memory_space<vmem>>, vector<8x128xf32>
    tpu.vector_store %arg11[%c0_27, %c0_28], %25#1 {strides = array<i32>} : memref<8x128xf32, #tpu.memory_space<vmem>>, vector<8x128xf32>,
    return
  }
  func.func @transform_0(%arg0: i32, %arg1: i32, %arg2: i32) -> (i32, i32, i32) {
    %c2_i32 = arith.constant 2 : i32
    %0 = arith.muli %c2_i32, %arg2 : i32
    %c0_i32 = arith.constant 0 : i32
    %1 = arith.subi %c0_i32, %0 : i32
    %2 = arith.muli %arg1, %1 : i32
    %3 = arith.addi %arg2, %2 : i32
    %c0_i32_0 = arith.constant 0 : i32
    %c0_i32_1 = arith.constant 0 : i32
    return %3, %arg0, %c0_i32_0 : i32, i32, i32
  }
  func.func @transform_1(%arg0: i32, %arg1: i32, %arg2: i32) -> (i32, i32) {
    %c0_i32 = arith.constant 0 : i32
    %c0_i32_0 = arith.constant 0 : i32
    return %arg0, %c0_i32 : i32, i32
  }
  func.func @transform_2(%arg0: i32, %arg1: i32, %arg2: i32) -> (i32, i32, i32) {
    %c0_i32 = arith.constant 0 : i32
    %c0_i32_0 = arith.constant 0 : i32
    %c0_i32_1 = arith.constant 0 : i32
    return %arg1, %c0_i32, %c0_i32_0 : i32, i32, i32
  }
  func.func @transform_3(%arg0: i32, %arg1: i32, %arg2: i32) -> (i32, i32, i32) {
    %c0_i32 = arith.constant 0 : i32
    %c0_i32_0 = arith.constant 0 : i32
    %c0_i32_1 = arith.constant 0 : i32
    return %arg1, %c0_i32, %c0_i32_0 : i32, i32, i32
  }
  func.func @transform_4(%arg0: i32, %arg1: i32, %arg2: i32) -> (i32, i32, i32) {
    %c0_i32 = arith.constant 0 : i32
    %c0_i32_0 = arith.constant 0 : i32
    %c0_i32_1 = arith.constant 0 : i32
    return %arg1, %c0_i32, %c0_i32_0 : i32, i32, i32
  }
  func.func @transform_5(%arg0: i32, %arg1: i32, %arg2: i32) -> (i32, i32, i32) {
    %c2_i32 = arith.constant 2 : i32
    %0 = arith.muli %c2_i32, %arg2 : i32
    %c0_i32 = arith.constant 0 : i32
    %1 = arith.subi %c0_i32, %0 : i32
    %2 = arith.muli %arg1, %1 : i32
    %3 = arith.addi %arg2, %2 : i32
    %c0_i32_0 = arith.constant 0 : i32
    return %3, %arg0, %arg1 : i32, i32, i32
  }
}

</mosaic_0001>

<bundles_post_ra>
// kernel: tpu_custom_call.1
= control target key start
LH: loop header
LB: loop body
LE: loop exit
PB: predicated region body
PF: predicated region fallthrough
CT: control target
= control target key end

     0   :  { %s2354_s0 = inlined_call_operand.hbm [shape: f32[4,8,128], index: 0, kind: input, shape index: {}]   ;;  %s2355_s1 = inlined_call_operand.vmem [shape: s32[8,1], index: 1, kind: input, shape index: {}]   ;;  %s2356_s2 = inlined_call_operand.hbm [shape: f32[2,128,512], index: 2, kind: input, shape index: {}]   ;;  %s2357_s3 = inlined_call_operand.hbm [shape: f32[2,128,512], index: 3, kind: input, shape index: {}]   ;;  %s2358_s4 = inlined_call_operand.vmem [shape: f32[2,1,512], index: 4, kind: input, shape index: {}]   ;;  %s2359_s5 = inlined_call_operand.hbm [shape: f32[4,8,256], index: 5, kind: output, shape index: {}]  }
   0x1   :  { %2374 = sst [smem:[#allocation43_spill]] %s2356_s2 }
   0x2   :  { %10 = vsyncpa [#allocation6], 0 }
   0x3   :  { %12 = vsyncpa [#allocation6 + $0x1], 0 }
   0x4   :  { %13 = vsyncpa [#allocation9], 0 }
   0x5   :  { %15 = vsyncpa [#allocation9 + $0x1], 0 }
   0x6   :  { %16 = vsyncpa [#allocation7], 0 }
   0x7   :  { %18 = vsyncpa [#allocation7 + $0x1], 0  ;;  %s1706_s18 = smov 0   ;;  %s1708_s19 = smov 0  }
   0x8   :  { %s1710_s20 = smov 0   ;;  %s1712_s21 = smov 0  }
   0x9   :  { %s1714_s22 = smov 0   ;;  %s1716_s23 = smov 0  }
   0xa LB: > { %2375 = sst [smem:[#allocation15_spill]] %s1644_s22  ;;  %s1737_s24 = sadd.s32 4294967295, %s1648_s23   ;;  %s1648_s23 = sphi %s1716_s23, %s24_s23   ;;  %s1644_s22 = sphi %s1714_s22, %s2453_s22   ;;  %s1640_s21 = sphi %s1712_s21, %s2452_s21   ;;  %s1636_s20 = sphi %s1710_s20, %s2456_s20   ;;  %s1632_s19 = sphi %s1708_s19, %s2455_s19   ;;  %s1628_s18 = sphi %s1706_s18, %s2454_s18  }
   0xb   : > { %s1176_s25 = sadd.s32 4294967294, %s1648_s23   ;;  %s39_s26 = sadd.s32 1, %s1644_s22 }
   0xc   : > { %s112_s27 = sadd.s32 1, %s1636_s20  ;;  %p41_p0 = scmp.ge.s32.totalorder %s39_s26, 2 }
   0xd   : > { %p119_p1 = scmp.ne.s32.totalorder %s1636_s20, %s1632_s19  ;;  %p2362_p2 = scmp.eq.s32.totalorder %s1648_s23, 0 }
   0xe   : > { %p125_p3 = scmp.ne.s32.totalorder %s1632_s19, %s1628_s18  ;;  %s2458_s26 = smov (%p41_p0, %s39_s26), 0 }
   0xf   : > { %2376 = sst [smem:[#allocation16_spill]] %s2458_s26  ;;  %p1751_p4 = por %p2362_p2, %p119_p1 }
  0x10   : > { %p2360_p5 = scmp.eq.s32.totalorder %s1737_s24, 0  ;;  %s109_s29 = ssub.s32 %s1644_s22, %s2458_s26 }
  0x11   : > { %p213_p6 = scmp.eq.s32.totalorder %s1737_s24, 1  ;;  %p110_p7 = scmp.eq.s32.totalorder %s109_s29, 0 }
  0x12   : > { %p1761_p8 = por %p2360_p5, %p125_p3  ;;  %p219_p10 = scmp.eq.s32.totalorder %s1176_s25, 1 }
  0x13   : > { %p1765_p9 = por %p213_p6, %p119_p1  ;;  %p2361_p13 = scmp.lt.s32.totalorder %s1648_s23, 2 }
  0x14   : > { %s2378_s30 = scalar_select %p1761_p8, 1, 0 }
  0x15   : > { %s2379_s6 = scalar_select %p1765_p9, 1, 0 }
  0x16   : > { %s1770_s7 = scalar_select %p110_p7, %s1636_s20, %s112_s27  }
  0x17   : > { %p1772_p11 = por %p219_p10, %p125_p3  ;;  %s272_s9 = sand.u32 1, %s1648_s23  }
  0x18   : > { %2380 = sst [smem:[#allocation17_spill]] %s1770_s7  ;;  %s274_s10 = sand.u32 1, %s1636_s20  }
  0x19   : > { %s2381_s8 = scalar_select %p1772_p11, 1, 0 }
  0x1a   : > { %s1780_s11 = sshll.u32 %s274_s10, 9  ;;  %s1203_s12 = sshll.u32 %s1644_s22, 13 }
  0x1b   : > { %s2382_s2 = sld [smem:[#allocation43_spill]]  ;;  %s276_s16 = scalar_lea.vmem [#allocation8], %s1780_s11 }
  0x1c   : > { %s283_s17 = sshll.u32 %s276_s16, 4  ;;  %p1797_p0 = pnand %p2361_p13, %p1751_p4  ;;  %s1791_s17 = int_to_ptr.vmem [resolvable:$true] %s283_s17 }
  0x1d   : > { %s1801_s27 = scalar_lea.sflag [#allocation9], %s272_s9 }
  0x1e   : > { %s2383_s25 = scalar_select %p1797_p0, 1, 0 }
  0x1f   : > { %p2366_p3 = pneg %p1797_p0 }
  0x21   : > { %s1788_s15 = scalar_lea.hbm %s2382_s2, %s1203_s12  ;;  %s1467_s28 = scalar_lea.hbm %s2382_s2, 16384 }
  0x22   : > { %s1462_s29 = scalar_lea.hbm %s1788_s15, 8192  ;;  %p1468_p4 = scmp.lt.u32.totalorder %s1788_s15, %s2382_s2 }
  0x23   : > { %p1463_p1 = scmp.ne.s32.totalorder %s1788_s15, %s1462_s29  ;;  %p1469_p10 = scmp.lt.u32.totalorder %s1467_s28, %s1462_s29 }
  0x24   : > { %p1471_p5 = scmp.lt.u32.totalorder %s1462_s29, %s1788_s15 }
  0x25   : > { %p1465_p6 = pnand %p2366_p3, %p1463_p1  ;;  %p1470_p12 = por %p1469_p10, %p1468_p4 }
  0x27   : > { %p1466_p7 = pneg %p1465_p6  ;;  %p1472_p13 = por %p1471_p5, %p1470_p12 }
  0x29   : > { %p1473_p2 = pnand %p1472_p13, %p1466_p7 }
  0x2b   : > { %1476 = shalt.err (!%p1473_p2)
}
  0x2c   : > { %s1477_s9 = scalar_lea.vmem %s1791_s17, 8192  ;;  %s1662_s10 = smov [#allocation8]  }
  0x2d   : > { %p1478_p1 = scmp.ne.s32.totalorder %s1791_s17, %s1477_s9  ;;  %s1482_s13 = sshll.u32 %s1662_s10, 4  ;;  %s1483_s13 = int_to_ptr.vmem [resolvable:$false] %s1482_s13 }
  0x2e   : > { %s1484_s14 = scalar_lea.vmem %s1483_s13, 16384  ;;  %p1485_p9 = scmp.lt.s32.totalorder %s1791_s17, %s1483_s13 }
  0x2f   : > { %p1480_p6 = pnand %p1478_p1, %p2366_p3  ;;  %p1486_p4 = scmp.lt.s32.totalorder %s1484_s14, %s1477_s9 }
  0x31   : > { %p1481_p11 = pneg %p1480_p6  ;;  %p1487_p10 = por %p1486_p4, %p1485_p9 }
  0x33   : > { %p1488_p5 = pnand %p1487_p10, %p1481_p11 }
  0x35   : > { %1491 = shalt.err (!%p1488_p5)
}
  0x36   : > { %s2365_s29 = smov 512   ;;  %s2370_s28 = smov 32  }
  0x37   : > { %1350 = dma.hbm_to_vmem [thread:$0]  (!%p1797_p0), %s1788_s15, 8192, %s1791_s17, %s1801_s27, %s2365_s29, %s2365_s29, %s2370_s28  }
  0x38   : > { %s1837_s10 = scalar_lea.hbm %s2357_s3, %s1203_s12  ;;  %s297_s13 = scalar_lea.vmem [#allocation10], %s1780_s11 }
  0x39   : > { %s304_s14 = sshll.u32 %s297_s13, 4  ;;  %p1187_p2 = scmp.ge.s32.totalorder %s1648_s23, 1  ;;  %s1840_s14 = int_to_ptr.vmem [resolvable:$true] %s304_s14 }
  0x3a   : > { %p319_p9 = scmp.lt.s32.totalorder %s1648_s23, 3  ;;  %s1665_s26 = smov [#allocation5]  }
  0x3b   : > { %s262_s7 = sshll.u32 %s1665_s26, 4  ;;  %p2385_p12 = scmp.eq.s32.totalorder %s1648_s23, 0  ;;  %s263_s7 = int_to_ptr.vmem [resolvable:$true] %s262_s7 }
  0x3c   : > { %p1844_p11 = pnand %p1187_p2, %p319_p9  ;;  %p2386_p13 = scmp.lt.s32.totalorder %s1648_s23, 2 }
  0x3d   : > { %s1492_s17 = scalar_lea.hbm %s2354_s0, 512 }
  0x3e   : > { %s2384_s2 = scalar_select %p1844_p11, 1, 0 }
  0x3f   : > { %p1852_p7 = pnand %p2386_p13, %p2385_p12  ;;  %p1493_p1 = scmp.ne.s32.totalorder %s2354_s0, %s1492_s17 }
  0x40   : > { %p1499_p5 = scmp.lt.u32.totalorder %s1492_s17, %s2354_s0 }
  0x41   : > { %p1494_p6 = pneg %p1852_p7 }
  0x43   : > { %p1495_p4 = pnand %p1494_p6, %p1493_p1 }
  0x45   : > { %p1496_p10 = pneg %p1495_p4 }
  0x47   : > { %p1501_p2 = pnand %p1499_p5, %p1496_p10 }
  0x49   : > { %1504 = shalt.err (!%p1501_p2)
}
  0x4a   : > { %s1505_s29 = scalar_lea.vmem %s263_s7, 512  ;;  %s1512_s12 = scalar_lea.vmem %s263_s7, 1024 }
  0x4b   : > { %p1506_p9 = scmp.ne.s32.totalorder %s263_s7, %s1505_s29  ;;  %p1513_p3 = scmp.lt.s32.totalorder %s263_s7, %s263_s7 }
  0x4c   : > { %p1514_p8 = scmp.lt.s32.totalorder %s1512_s12, %s1505_s29 }
  0x4d   : > { %p1508_p12 = pnand %p1506_p9, %p1494_p6 }
  0x4e   : > { %p1515_p11 = por %p1514_p8, %p1513_p3 }
  0x4f   : > { %p1509_p13 = pneg %p1508_p12 }
  0x51   : > { %p1516_p0 = pnand %p1515_p11, %p1509_p13 }
  0x53   : > { %1519 = shalt.err (!%p1516_p0)
}
  0x54   : > { %s1666_s11 = smov 128   ;;  %s1667_s17 = smov 8  }
  0x55   : > { %1347 = dma.hbm_to_vmem [thread:$0]  (!%p1852_p7), %s2354_s0, 512, %s263_s7, [#allocation6], %s1666_s11, %s1666_s11, %s1667_s17  }
  0x56   : > { %s1520_s26 = scalar_lea.hbm %s1837_s10, 8192  ;;  %p2388_p6 = scmp.ne.s32.totalorder %s2383_s25, 0 }
  0x57   : > { %p1521_p1 = scmp.ne.s32.totalorder %s1837_s10, %s1520_s26  ;;  %s1525_s12 = scalar_lea.hbm %s2357_s3, 16384 }
  0x58   : > { %p2389_p4 = pneg %p2388_p6  ;;  %p1526_p0 = scmp.lt.u32.totalorder %s1837_s10, %s2357_s3 }
  0x59   : > { %p1527_p11 = scmp.lt.u32.totalorder %s1525_s12, %s1520_s26  ;;  %p1529_p5 = scmp.lt.u32.totalorder %s1520_s26, %s1837_s10 }
  0x5a   : > { %p1523_p8 = pnand %p1521_p1, %p2389_p4 }
  0x5b   : > { %p1528_p10 = por %p1527_p11, %p1526_p0 }
  0x5c   : > { %p1524_p3 = pneg %p1523_p8 }
  0x5d   : > { %p1530_p2 = por %p1529_p5, %p1528_p10 }
  0x5f   : > { %p1531_p9 = pnand %p1530_p2, %p1524_p3 }
  0x61   : > { %1534 = shalt.err (!%p1531_p9)
}
  0x62   : > { %s1535_s7 = scalar_lea.vmem %s1840_s14, 8192  ;;  %p2390_p12 = pmov %p2389_p4 }
  0x63   : > { %p1536_p7 = scmp.ne.s32.totalorder %s1840_s14, %s1535_s7  ;;  %s1668_s15 = smov [#allocation10]  }
  0x64   : > { %s1540_s11 = sshll.u32 %s1668_s15, 4  ;;  %s1541_s11 = int_to_ptr.vmem [resolvable:$false] %s1540_s11 }
  0x65   : > { %p1538_p13 = pnand %p1536_p7, %p2390_p12  ;;  %s1542_s22 = scalar_lea.vmem %s1541_s11, 16384 }
  0x66   : > { %p1543_p4 = scmp.lt.s32.totalorder %s1840_s14, %s1541_s11  ;;  %p1544_p8 = scmp.lt.s32.totalorder %s1542_s22, %s1535_s7 }
  0x67   : > { %p1539_p1 = pneg %p1538_p13 }
  0x68   : > { %p1545_p0 = por %p1544_p8, %p1543_p4 }
  0x6a   : > { %p1546_p11 = pnand %p1545_p0, %p1539_p1 }
  0x6c   : > { %1549 = shalt.err (!%p1546_p11)
}
  0x6d   : > { %s2391_s28 = smov 32   ;;  %s2392_s17 = smov 512  }
  0x6e   : > { %1353 = dma.hbm_to_vmem [thread:$0]  (!%p2388_p6), %s1837_s10, 8192, %s1840_s14, %s1801_s27, %s2392_s17, %s2392_s17, %s2391_s28  }
  0x6f   : > { %p2393_p3 = scmp.ne.s32.totalorder %s2384_s2, 0 }
  0x71   : > { %323 = sbr.rel (%p2393_p3) target bundleno = 728 (0x2d8), region = 40 }
  0x78   : > { %p2394_p10 = scmp.eq.s32.totalorder %s1737_s24, 0 }
  0x7a   : > { %1615 = dma.done.wait (%p2394_p10), [#allocation6], 512   ;;  %p2395_p5 = pmov %p2394_p10 }
  0x7b   : > { %s334_s25 = sand.u32 1, %s1737_s24   ;;  %s1907_s16 = sand.u32 1, %s1632_s19  }
  0x7c   : > { %1617 = vsyncadd (%p2395_p5), [#allocation6], 4294966784  ;;  %s1189_s9 = sshll.u32 %s1907_s16, 9  ;;  %s335_s26 = scalar_lea.sflag [#allocation9], %s334_s25 }
  0x7d   : > { %s1910_s29 = scalar_lea.vmem [#allocation8], %s1189_s9  ;;  %p2396_p6 = scmp.ne.s32.totalorder %s2378_s30, 0 }
  0x7f   : > { %1619 = dma.done.wait (%p2396_p6), %s335_s26, 16384  }
  0x80   : > { %1621 = vsyncadd (%p2396_p6), %s335_s26, 4294950912  ;;  %s1191_s2 = sshll.u32 %s1907_s16, 5  ;;  %v2372_v0 = vmov 0.0   ;;  %s1919_s24 = scalar_lea.vmem [#allocation10], %s1189_s9 }
  0x81   : > { %574 = vmatprep.mubr.f32.mxu0 %v2372_v0  ;;  %663 = vmatprep.mubr.f32.mxu1 %v2372_v0  ;;  %v1922_v1 = vld [vmem:[%s1919_s24] sm:$0xff]  ;;  %v1925_v2 = vld [vmem:[%s1919_s24 + $0x8] sm:$0xff]  ;;  %v1928_v3 = vld [vmem:[%s1919_s24 + $0x10] sm:$0xff]  ;;  %p401_p2 = scmp.lt.s32.totalorder %s1640_s21, 1  ;;  %s2195_s15 = scalar_lea.vmem [#allocation11], %s1191_s2 }
  0x82   : > { %v1931_v4 = vld [vmem:[%s1919_s24 + $0x18] sm:$0xff]  ;;  %v1934_v5 = vld [vmem:[%s1919_s24 + $0x20] sm:$0xff]  ;;  %v1937_v6 = vld [vmem:[%s1919_s24 + $0x28] sm:$0xff]  ;;  %s2201_s11 = smov 0  }
  0x83   : > { %v1940_v7 = vld [vmem:[%s1919_s24 + $0x30] sm:$0xff]  ;;  %v1943_v8 = vld [vmem:[%s1919_s24 + $0x38] sm:$0xff]  ;;  %v1946_v9 = vld [vmem:[%s1919_s24 + $0x40] sm:$0xff]  ;;  %s402_s10 = scalar_select %p401_p2, %s1640_s21, 1 }
  0x84   : > { %v1949_v10 = vld [vmem:[%s1919_s24 + $0x48] sm:$0xff]  ;;  %v1952_v11 = vld [vmem:[%s1919_s24 + $0x50] sm:$0xff]  ;;  %v1955_v12 = vld [vmem:[%s1919_s24 + $0x58] sm:$0xff] }
  0x85   : > { %v1958_v13 = vld [vmem:[%s1919_s24 + $0x60] sm:$0xff]  ;;  %v1961_v14 = vld [vmem:[%s1919_s24 + $0x68] sm:$0xff]  ;;  %v1964_v15 = vld [vmem:[%s1919_s24 + $0x70] sm:$0xff]  ;;  %s1192_s14 = sshll.u32 %s402_s10, 2 }
  0x86   : > { %v1967_v16 = vld [vmem:[%s1919_s24 + $0x78] sm:$0xff]  ;;  %v1970_v17 = vld [vmem:[%s1919_s24 + $0x80] sm:$0xff]  ;;  %v1973_v18 = vld [vmem:[%s1919_s24 + $0x88] sm:$0xff]  ;;  %s404_s7 = scalar_lea.vmem %s2358_s4, %s1192_s14 }
  0x87   : > { %v1976_v19 = vld [vmem:[%s1919_s24 + $0x90] sm:$0xff]  ;;  %v1979_v20 = vld [vmem:[%s1919_s24 + $0x98] sm:$0xff]  ;;  %v1982_v21 = vld [vmem:[%s1919_s24 + $0xa0] sm:$0xff] }
  0x88   : > { %v1985_v22 = vld [vmem:[%s1919_s24 + $0xa8] sm:$0xff]  ;;  %v1988_v23 = vld [vmem:[%s1919_s24 + $0xb0] sm:$0xff]  ;;  %v1991_v24 = vld [vmem:[%s1919_s24 + $0xb8] sm:$0xff] }
  0x89   : > { %v1994_v25 = vld [vmem:[%s1919_s24 + $0xc0] sm:$0xff]  ;;  %v1997_v26 = vld [vmem:[%s1919_s24 + $0xc8] sm:$0xff]  ;;  %v2000_v27 = vld [vmem:[%s1919_s24 + $0xd0] sm:$0xff] }
  0x8a   : > { %v2003_v28 = vld [vmem:[%s1919_s24 + $0xd8] sm:$0xff]  ;;  %v2006_v29 = vld [vmem:[%s1919_s24 + $0xe0] sm:$0xff]  ;;  %v2009_v30 = vld [vmem:[%s1919_s24 + $0xe8] sm:$0xff] }
  0x8b   : > { %v2012_v31 = vld [vmem:[%s1919_s24 + $0xf0] sm:$0xff]  ;;  %v2015_v32 = vld [vmem:[%s1919_s24 + $0xf8] sm:$0xff]  ;;  %v2018_v33 = vld [vmem:[%s1919_s24 + $0x100] sm:$0xff] }
  0x8c   : > { %v2021_v34 = vld [vmem:[%s1919_s24 + $0x108] sm:$0xff]  ;;  %v2024_v35 = vld [vmem:[%s1919_s24 + $0x110] sm:$0xff]  ;;  %v2027_v36 = vld [vmem:[%s1919_s24 + $0x118] sm:$0xff] }
  0x8d   : > { %2397 = vst [vmem:[#allocation18_spill] sm:$0xff] %v2024_v35  ;;  %v2030_v37 = vld [vmem:[%s1919_s24 + $0x120] sm:$0xff]  ;;  %v2033_v38 = vld [vmem:[%s1919_s24 + $0x128] sm:$0xff]  ;;  %v2036_v39 = vld [vmem:[%s1919_s24 + $0x130] sm:$0xff] }
  0x8e   : > { %2398 = vst [vmem:[#allocation19_spill] sm:$0xff] %v2036_v39  ;;  %v2039_v40 = vld [vmem:[%s1919_s24 + $0x138] sm:$0xff]  ;;  %v2042_v41 = vld [vmem:[%s1919_s24 + $0x140] sm:$0xff]  ;;  %v2045_v42 = vld [vmem:[%s1919_s24 + $0x148] sm:$0xff] }
  0x8f   : > { %2399 = vst [vmem:[#allocation20_spill] sm:$0xff] %v2042_v41  ;;  %v2048_v43 = vld [vmem:[%s1919_s24 + $0x150] sm:$0xff]  ;;  %v2051_v44 = vld [vmem:[%s1919_s24 + $0x158] sm:$0xff]  ;;  %v2054_v45 = vld [vmem:[%s1919_s24 + $0x160] sm:$0xff] }
  0x90   : > { %2400 = vst [vmem:[#allocation21_spill] sm:$0xff] %v2048_v43  ;;  %2401 = vst [vmem:[#allocation22_spill] sm:$0xff] %v2051_v44  ;;  %v2057_v46 = vld [vmem:[%s1919_s24 + $0x168] sm:$0xff]  ;;  %v2060_v47 = vld [vmem:[%s1919_s24 + $0x170] sm:$0xff] }
  0x91   : > { %2402 = vst [vmem:[#allocation23_spill] sm:$0xff] %v2054_v45  ;;  %2403 = vst [vmem:[#allocation24_spill] sm:$0xff] %v2057_v46  ;;  %v2063_v48 = vld [vmem:[%s1919_s24 + $0x178] sm:$0xff]  ;;  %v2066_v49 = vld [vmem:[%s1919_s24 + $0x180] sm:$0xff] }
  0x92   : > { %2404 = vst [vmem:[#allocation25_spill] sm:$0xff] %v2060_v47  ;;  %2405 = vst [vmem:[#allocation26_spill] sm:$0xff] %v2063_v48  ;;  %v2069_v50 = vld [vmem:[%s1919_s24 + $0x188] sm:$0xff]  ;;  %v2072_v51 = vld [vmem:[%s1919_s24 + $0x190] sm:$0xff] }
  0x93   : > { %2406 = vst [vmem:[#allocation27_spill] sm:$0xff] %v2066_v49  ;;  %2407 = vst [vmem:[#allocation28_spill] sm:$0xff] %v2069_v50  ;;  %v2075_v52 = vld [vmem:[%s1919_s24 + $0x198] sm:$0xff]  ;;  %v2078_v53 = vld [vmem:[%s1919_s24 + $0x1a0] sm:$0xff] }
  0x94   : > { %2408 = vst [vmem:[#allocation29_spill] sm:$0xff] %v2072_v51  ;;  %2409 = vst [vmem:[#allocation30_spill] sm:$0xff] %v2075_v52  ;;  %v2081_v54 = vld [vmem:[%s1919_s24 + $0x1a8] sm:$0xff]  ;;  %v2084_v55 = vld [vmem:[%s1919_s24 + $0x1b0] sm:$0xff] }
  0x95   : > { %2410 = vst [vmem:[#allocation31_spill] sm:$0xff] %v2078_v53  ;;  %2411 = vst [vmem:[#allocation32_spill] sm:$0xff] %v2081_v54  ;;  %v2087_v56 = vld [vmem:[%s1919_s24 + $0x1b8] sm:$0xff]  ;;  %v2090_v57 = vld [vmem:[%s1919_s24 + $0x1c0] sm:$0xff] }
  0x96   : > { %2412 = vst [vmem:[#allocation33_spill] sm:$0xff] %v2084_v55  ;;  %2413 = vst [vmem:[#allocation34_spill] sm:$0xff] %v2087_v56  ;;  %v2093_v58 = vld [vmem:[%s1919_s24 + $0x1c8] sm:$0xff]  ;;  %v2096_v59 = vld [vmem:[%s1919_s24 + $0x1d0] sm:$0xff] }
  0x97   : > { %2414 = vst [vmem:[#allocation35_spill] sm:$0xff] %v2090_v57  ;;  %2415 = vst [vmem:[#allocation36_spill] sm:$0xff] %v2093_v58  ;;  %v2099_v60 = vld [vmem:[%s1919_s24 + $0x1d8] sm:$0xff]  ;;  %v2102_v61 = vld [vmem:[%s1919_s24 + $0x1e0] sm:$0xff] }
  0x98   : > { %2416 = vst [vmem:[#allocation37_spill] sm:$0xff] %v2096_v59  ;;  %2417 = vst [vmem:[#allocation38_spill] sm:$0xff] %v2099_v60  ;;  %v2105_v62 = vld [vmem:[%s1919_s24 + $0x1e8] sm:$0xff]  ;;  %v2108_v63 = vld [vmem:[%s1919_s24 + $0x1f0] sm:$0xff] }
  0x99   : > { %2418 = vst [vmem:[#allocation39_spill] sm:$0xff] %v2102_v61  ;;  %2419 = vst [vmem:[#allocation40_spill] sm:$0xff] %v2105_v62  ;;  %v2111_v0 = vld [vmem:[%s1919_s24 + $0x1f8] sm:$0xff]  ;;  %v2116_v57 = vld [vmem:[%s2355_s1] sm:$0xff] }
  0x9a   : > { %2420 = vst [vmem:[#allocation41_spill] sm:$0xff] %v2108_v63  ;;  %2421 = vst [vmem:[#allocation42_spill] sm:$0xff] %v2111_v0  ;;  %v425_v55 = vld [vmem:[%s1910_s29 + $0x8] sm:$0xff]  ;;  %v427_v60 = vld [vmem:[%s1910_s29 + $0x18] sm:$0xff] }
  0x9b   : > { %v429_v59 = vld [vmem:[%s1910_s29 + $0x28] sm:$0xff]  ;;  %v431_v51 = vld [vmem:[%s1910_s29 + $0x38] sm:$0xff]  ;;  %v424_v62 = vld [vmem:[%s1910_s29] sm:$0xff] }
  0x9c   : > { %v1206_v61 = vpack.c.bf16 %v429_v59, %v425_v55  ;;  %v1238_v58 = vpack.c.bf16 %v431_v51, %v427_v60  ;;  %v428_v53 = vld [vmem:[%s1910_s29 + $0x20] sm:$0xff]  ;;  %v426_v63 = vld [vmem:[%s1910_s29 + $0x10] sm:$0xff]  ;;  %v433_v56 = vld [vmem:[%s1910_s29 + $0x48] sm:$0xff] }
  0x9d   : > { %v1208_v0 = vpack.c.bf16 %v428_v53, %v424_v62  ;;  %v430_v49 = vld [vmem:[%s1910_s29 + $0x30] sm:$0xff]  ;;  %v437_v52 = vld [vmem:[%s1910_s29 + $0x68] sm:$0xff]  ;;  %v435_v54 = vld [vmem:[%s1910_s29 + $0x58] sm:$0xff] }
  0x9e   : > { %1207 = vmatprep.subr.bf16.mxu0 %v1206_v61  ;;  %1239 = vmatprep.subr.bf16.mxu1 %v1238_v58  ;;  %v1240_v47 = vpack.c.bf16 %v430_v49, %v426_v63  ;;  %v1210_v43 = vpack.c.bf16 %v437_v52, %v433_v56  ;;  %v439_v55 = vld [vmem:[%s1910_s29 + $0x78] sm:$0xff]  ;;  %v432_v51 = vld [vmem:[%s1910_s29 + $0x40] sm:$0xff]  ;;  %v434_v53 = vld [vmem:[%s1910_s29 + $0x50] sm:$0xff] }
  0x9f   : > { %1209 = vmatpush1.bf16.msra.mxu0 %v1208_v0  ;;  %v1242_v59 = vpack.c.bf16 %v439_v55, %v435_v54  ;;  %v436_v60 = vld [vmem:[%s1910_s29 + $0x60] sm:$0xff]  ;;  %v438_v62 = vld [vmem:[%s1910_s29 + $0x70] sm:$0xff]  ;;  %v441_v52 = vld [vmem:[%s1910_s29 + $0x88] sm:$0xff] }
  0xa0   : > { %1241 = vmatpush1.bf16.msra.mxu1 %v1240_v47  ;;  %1211 = vmatprep.subr.bf16.mxu0 %v1210_v43  ;;  %v1212_v58 = vpack.c.bf16 %v436_v60, %v432_v51  ;;  %v1244_v49 = vpack.c.bf16 %v438_v62, %v434_v53  ;;  %v445_v56 = vld [vmem:[%s1910_s29 + $0xa8] sm:$0xff]  ;;  %v443_v61 = vld [vmem:[%s1910_s29 + $0x98] sm:$0xff]  ;;  %v440_v54 = vld [vmem:[%s1910_s29 + $0x80] sm:$0xff] }
  0xa1   : > { %1243 = vmatprep.subr.bf16.mxu1 %v1242_v59  ;;  %v1214_v0 = vpack.c.bf16 %v445_v56, %v441_v52  ;;  %v447_v63 = vld [vmem:[%s1910_s29 + $0xb8] sm:$0xff]  ;;  %v444_v55 = vld [vmem:[%s1910_s29 + $0xa0] sm:$0xff]  ;;  %v442_v45 = vld [vmem:[%s1910_s29 + $0x90] sm:$0xff] }
  0xa2   : > { %v1246_v50 = vpack.c.bf16 %v447_v63, %v443_v61  ;;  %v446_v47 = vld [vmem:[%s1910_s29 + $0xb0] sm:$0xff]  ;;  %v449_v43 = vld [vmem:[%s1910_s29 + $0xc8] sm:$0xff]  ;;  %v1216_v51 = vpack.c.bf16 %v444_v55, %v440_v54  ;;  %v451_v59 = vld [vmem:[%s1910_s29 + $0xd8] sm:$0xff] }
  0xa3   : > { %1213 = vmatpush1.bf16.msra.mxu0 %v1212_v58  ;;  %v453_v60 = vld [vmem:[%s1910_s29 + $0xe8] sm:$0xff]  ;;  %v455_v53 = vld [vmem:[%s1910_s29 + $0xf8] sm:$0xff]  ;;  %v1248_v62 = vpack.c.bf16 %v446_v47, %v442_v45  ;;  %v448_v56 = vld [vmem:[%s1910_s29 + $0xc0] sm:$0xff] }
  0xa4   : > { %1245 = vmatpush1.bf16.msra.mxu1 %v1244_v49  ;;  %1215 = vmatprep.subr.bf16.mxu0 %v1214_v0  ;;  %v1218_v52 = vpack.c.bf16 %v453_v60, %v449_v43  ;;  %v452_v61 = vld [vmem:[%s1910_s29 + $0xe0] sm:$0xff]  ;;  %v450_v63 = vld [vmem:[%s1910_s29 + $0xd0] sm:$0xff]  ;;  %v1250_v41 = vpack.c.bf16 %v455_v53, %v451_v59  ;;  %v457_v54 = vld [vmem:[%s1910_s29 + $0x108] sm:$0xff] }
  0xa5   : > { %1247 = vmatprep.subr.bf16.mxu1 %v1246_v50  ;;  %v454_v58 = vld [vmem:[%s1910_s29 + $0xf0] sm:$0xff]  ;;  %v461_v55 = vld [vmem:[%s1910_s29 + $0x128] sm:$0xff]  ;;  %v459_v48 = vld [vmem:[%s1910_s29 + $0x118] sm:$0xff]  ;;  %v1220_v45 = vpack.c.bf16 %v452_v61, %v448_v56 }
  0xa6   : > { %v463_v49 = vld [vmem:[%s1910_s29 + $0x138] sm:$0xff]  ;;  %v1252_v0 = vpack.c.bf16 %v454_v58, %v450_v63  ;;  %v1222_v47 = vpack.c.bf16 %v461_v55, %v457_v54  ;;  %v456_v43 = vld [vmem:[%s1910_s29 + $0x100] sm:$0xff]  ;;  %v458_v60 = vld [vmem:[%s1910_s29 + $0x110] sm:$0xff] }
  0xa7   : > { %1217 = vmatpush1.bf16.msra.mxu0 %v1216_v51  ;;  %v460_v50 = vld [vmem:[%s1910_s29 + $0x120] sm:$0xff]  ;;  %v1254_v59 = vpack.c.bf16 %v463_v49, %v459_v48  ;;  %v462_v53 = vld [vmem:[%s1910_s29 + $0x130] sm:$0xff]  ;;  %v465_v44 = vld [vmem:[%s1910_s29 + $0x148] sm:$0xff] }
  0xa8   : > { %1249 = vmatpush1.bf16.msra.mxu1 %v1248_v62  ;;  %1219 = vmatprep.subr.bf16.mxu0 %v1218_v52  ;;  %v469_v39 = vld [vmem:[%s1910_s29 + $0x168] sm:$0xff]  ;;  %v467_v51 = vld [vmem:[%s1910_s29 + $0x158] sm:$0xff]  ;;  %v1224_v52 = vpack.c.bf16 %v460_v50, %v456_v43  ;;  %v1256_v56 = vpack.c.bf16 %v462_v53, %v458_v60  ;;  %v464_v63 = vld [vmem:[%s1910_s29 + $0x140] sm:$0xff] }
  0xa9   : > { %1251 = vmatprep.subr.bf16.mxu1 %v1250_v41  ;;  %v471_v62 = vld [vmem:[%s1910_s29 + $0x178] sm:$0xff]  ;;  %v1226_v61 = vpack.c.bf16 %v469_v39, %v465_v44  ;;  %v468_v41 = vld [vmem:[%s1910_s29 + $0x160] sm:$0xff]  ;;  %v466_v48 = vld [vmem:[%s1910_s29 + $0x150] sm:$0xff] }
  0xaa   : > { %v1258_v58 = vpack.c.bf16 %v471_v62, %v467_v51  ;;  %v470_v54 = vld [vmem:[%s1910_s29 + $0x170] sm:$0xff]  ;;  %v473_v55 = vld [vmem:[%s1910_s29 + $0x188] sm:$0xff]  ;;  %v1228_v39 = vpack.c.bf16 %v468_v41, %v464_v63  ;;  %v472_v43 = vld [vmem:[%s1910_s29 + $0x180] sm:$0xff] }
  0xab   : > { %1221 = vmatpush1.bf16.msra.mxu0 %v1220_v45  ;;  %v477_v49 = vld [vmem:[%s1910_s29 + $0x1a8] sm:$0xff]  ;;  %v475_v45 = vld [vmem:[%s1910_s29 + $0x198] sm:$0xff]  ;;  %v1260_v44 = vpack.c.bf16 %v470_v54, %v466_v48  ;;  %v476_v50 = vld [vmem:[%s1910_s29 + $0x1a0] sm:$0xff] }
  0xac   : > { %1253 = vmatpush1.bf16.msra.mxu1 %v1252_v0  ;;  %1223 = vmatprep.subr.bf16.mxu0 %v1222_v47  ;;  %v479_v0 = vld [vmem:[%s1910_s29 + $0x1b8] sm:$0xff]  ;;  %v1230_v47 = vpack.c.bf16 %v477_v49, %v473_v55  ;;  %v474_v60 = vld [vmem:[%s1910_s29 + $0x190] sm:$0xff]  ;;  %v481_v51 = vld [vmem:[%s1910_s29 + $0x1c8] sm:$0xff] }
  0xad   : > { %1255 = vmatprep.subr.bf16.mxu1 %v1254_v59  ;;  %v1262_v59 = vpack.c.bf16 %v479_v0, %v475_v45  ;;  %v478_v53 = vld [vmem:[%s1910_s29 + $0x1b0] sm:$0xff]  ;;  %v485_v62 = vld [vmem:[%s1910_s29 + $0x1e8] sm:$0xff]  ;;  %v483_v35 = vld [vmem:[%s1910_s29 + $0x1d8] sm:$0xff]  ;;  %v2422_v0 = vmov 0.0  }
  0xae   : > { %v487_v46 = vld [vmem:[%s1910_s29 + $0x1f8] sm:$0xff]  ;;  %v480_v63 = vld [vmem:[%s1910_s29 + $0x1c0] sm:$0xff]  ;;  %v482_v54 = vld [vmem:[%s1910_s29 + $0x1d0] sm:$0xff] }
  0xaf   : > { %1225 = vmatpush1.bf16.msra.mxu0 %v1224_v52  ;;  %v1232_v52 = vpack.c.bf16 %v476_v50, %v472_v43  ;;  %v484_v41 = vld [vmem:[%s1910_s29 + $0x1e0] sm:$0xff]  ;;  %v1266_v48 = vpack.c.bf16 %v487_v46, %v483_v35  ;;  %v422_v35 = vld [vmem:[#allocation5 + $0x10] sm:$0xff]  ;;  %v423_v46 = vld [vmem:[#allocation5 + $0x18] sm:$0xff] }
  0xb0   : > { %1257 = vmatpush1.bf16.msra.mxu1 %v1256_v56  ;;  %1227 = vmatprep.subr.bf16.mxu0 %v1226_v61  ;;  %v1264_v56 = vpack.c.bf16 %v478_v53, %v474_v60  ;;  %v1234_v61 = vpack.c.bf16 %v485_v62, %v481_v51  ;;  %v1236_v55 = vpack.c.bf16 %v484_v41, %v480_v63  ;;  %v420_v45 = vld [vmem:[#allocation5] sm:$0xff] }
  0xb1   : > { %1259 = vmatprep.subr.bf16.mxu1 %v1258_v58  ;;  %v486_v58 = vld [vmem:[%s1910_s29 + $0x1f0] sm:$0xff]  ;;  %v488_v50 = vld [vmem:[%s404_s7] sm:$0xf] }
  0xb2   : > { %v1268_v49 = vpack.c.bf16 %v486_v58, %v482_v54 }
  0xb3   : > { %1229 = vmatpush1.bf16.msra.mxu0 %v1228_v39  ;;  %v421_v39 = vld [vmem:[#allocation5 + $0x8] sm:$0xff] }
  0xb4   : > { %1261 = vmatpush1.bf16.msra.mxu1 %v1260_v44  ;;  %1231 = vmatprep.subr.bf16.mxu0 %v1230_v47  ;;  %v490_v44 = vlaneseq }
  0xb5   : > { %1263 = vmatprep.subr.bf16.mxu1 %v1262_v59 }
  0xb6   : > { %v491_v47 = vshrl.u32 %v490_v44, 7 }
  0xb7   : > { %1233 = vmatpush1.bf16.msra.mxu0 %v1232_v52 }
  0xb8   : > { %1265 = vmatpush1.bf16.msra.mxu1 %v1264_v56  ;;  %1235 = vmatprep.subr.bf16.mxu0 %v1234_v61  ;;  %v492_v43 = vsub.s32 0, %v491_v47  ;;  %v500_v60 = vsub.s32 2, %v491_v47  ;;  %v496_v59 = vsub.s32 1, %v491_v47  ;;  %v504_v53 = vsub.s32 3, %v491_v47 }
  0xb9   : > { %1267 = vmatprep.subr.bf16.mxu1 %v1266_v48 }
  0xba   : > { %v493_v51 = vrot.slane %v488_v50, %v492_v43  ;;  %v501_v62 = vrot.slane %v488_v50, %v500_v60  ;;  %v497_v52 = vrot.slane %v488_v50, %v496_v59  ;;  %v505_v56 = vrot.slane %v488_v50, %v504_v53 }
  0xbb   : > { %1237 = vmatpush1.bf16.msra.mxu0 %v1236_v55 }
  0xbc   : > { %1269 = vmatpush1.bf16.msra.mxu1 %v1268_v49 }
  0xbe   : > { %575 = vmatmul.mubr.f32.vlgmr.msra.gmra.mrb[0].mxu0 %v420_v45 }
  0xbf   : > { %664 = vmatmul.mubr.f32.vlgmr.msra.gmra.mrb[0].mxu1 %v420_v45  ;;  %580 = vmatprep.mubr.f32.mxu0 %v2422_v0 }
  0xc0   : > { %669 = vmatprep.mubr.f32.mxu1 %v2422_v0 }
  0xc2   : > { %581 = vmatmul.mubr.f32.gmra.mrb[2].mxu0 %v421_v39 }
  0xc3   : > { %670 = vmatmul.mubr.f32.gmra.mrb[2].mxu1 %v421_v39  ;;  %586 = vmatprep.mubr.f32.mxu0 %v2422_v0 }
  0xc4   : > { %675 = vmatprep.mubr.f32.mxu1 %v2422_v0 }
  0xc6   : > { %587 = vmatmul.mubr.f32.gmra.mrb[4].mxu0 %v422_v35 }
  0xc7   : > { %676 = vmatmul.mubr.f32.gmra.mrb[4].mxu1 %v422_v35  ;;  %592 = vmatprep.mubr.f32.mxu0 %v2422_v0 }
  0xc8   : > { %681 = vmatprep.mubr.f32.mxu1 %v2422_v0 }
  0xca   : > { %593 = vmatmul.mubr.f32.gmra.mrb[6].mxu0 %v423_v46 }
  0xcb   : > { %682 = vmatmul.mubr.f32.gmra.mrb[6].mxu1 %v423_v46 }
 0x191   : > { %v576_v61 = vpop.f32.mrb[0].mxu0 }
 0x192   : > { %v577_v63 = vadd.f32 %v576_v61, %v493_v51  ;;  %v665_v41 = vpop.f32.mrb[0].mxu1  ;;  %v578_v48 = vpop.f32.mrb[1].mxu0 }
 0x193   : > { %v666_v54 = vadd.f32 %v665_v41, %v501_v62  ;;  %v579_v58 = vadd.f32 %v578_v48, %v497_v52  ;;  %v667_v55 = vpop.f32.mrb[1].mxu1 }
 0x194   : > { %688 = vst [vmem:[#allocation2] sm:$0xff] %v577_v63  ;;  %v668_v49 = vadd.f32 %v667_v55, %v505_v56 }
 0x195   : > { %690 = vst [vmem:[#allocation2 + $0x10] sm:$0xff] %v666_v54  ;;  %689 = vst [vmem:[#allocation2 + $0x8] sm:$0xff] %v579_v58  ;;  %v582_v45 = vpop.f32.mrb[2].mxu0 }
 0x196   : > { %691 = vst [vmem:[#allocation2 + $0x18] sm:$0xff] %v668_v49  ;;  %v583_v0 = vadd.f32 %v582_v45, %v493_v51  ;;  %v671_v39 = vpop.f32.mrb[2].mxu1  ;;  %v584_v35 = vpop.f32.mrb[3].mxu0 }
 0x197   : > { %v672_v46 = vadd.f32 %v671_v39, %v501_v62  ;;  %v585_v44 = vadd.f32 %v584_v35, %v497_v52  ;;  %v673_v47 = vpop.f32.mrb[3].mxu1 }
 0x198   : > { %692 = vst [vmem:[#allocation2 + $0x20] sm:$0xff] %v583_v0  ;;  %v674_v43 = vadd.f32 %v673_v47, %v505_v56 }
 0x199   : > { %694 = vst [vmem:[#allocation2 + $0x30] sm:$0xff] %v672_v46  ;;  %693 = vst [vmem:[#allocation2 + $0x28] sm:$0xff] %v585_v44  ;;  %v588_v50 = vpop.f32.mrb[4].mxu0  ;;  %v2197_v46 = vmov 0.0   ;;  %v2199_v44 = vmov 0.0  }
 0x19a   : > { %695 = vst [vmem:[#allocation2 + $0x38] sm:$0xff] %v674_v43  ;;  %v589_v60 = vadd.f32 %v588_v50, %v493_v51  ;;  %v677_v59 = vpop.f32.mrb[4].mxu1  ;;  %v590_v53 = vpop.f32.mrb[5].mxu0 }
 0x19b   : > { %v678_v61 = vadd.f32 %v677_v59, %v501_v62  ;;  %v591_v63 = vadd.f32 %v590_v53, %v497_v52  ;;  %v679_v41 = vpop.f32.mrb[5].mxu1 }
 0x19c   : > { %696 = vst [vmem:[#allocation2 + $0x40] sm:$0xff] %v589_v60  ;;  %v680_v48 = vadd.f32 %v679_v41, %v505_v56 }
 0x19d   : > { %698 = vst [vmem:[#allocation2 + $0x50] sm:$0xff] %v678_v61  ;;  %697 = vst [vmem:[#allocation2 + $0x48] sm:$0xff] %v591_v63  ;;  %v594_v54 = vpop.f32.mrb[6].mxu0 }
 0x19e   : > { %699 = vst [vmem:[#allocation2 + $0x58] sm:$0xff] %v680_v48  ;;  %v595_v58 = vadd.f32 %v594_v54, %v493_v51  ;;  %v683_v55 = vpop.f32.mrb[6].mxu1  ;;  %v596_v49 = vpop.f32.mrb[7].mxu0 }
 0x19f   : > { %v684_v45 = vadd.f32 %v683_v55, %v501_v62  ;;  %v597_v0 = vadd.f32 %v596_v49, %v497_v52  ;;  %v685_v39 = vpop.f32.mrb[7].mxu1 }
 0x1a0   : > { %700 = vst [vmem:[#allocation2 + $0x60] sm:$0xff] %v595_v58  ;;  %v686_v35 = vadd.f32 %v685_v39, %v505_v56 }
 0x1a1   : > { %702 = vst [vmem:[#allocation2 + $0x70] sm:$0xff] %v684_v45  ;;  %701 = vst [vmem:[#allocation2 + $0x68] sm:$0xff] %v597_v0 }
 0x1a2   : > { %703 = vst [vmem:[#allocation2 + $0x78] sm:$0xff] %v686_v35 }
 0x1a3 LB: >> { %v1270_v51 = vpack.c.bf16 %v1937_v6, %v1925_v2  ;;  %v1272_v62 = vpack.c.bf16 %v1934_v5, %v1922_v1  ;;  %v1274_v52 = vpack.c.bf16 %v1961_v14, %v1949_v10  ;;  %p780_p9 = scmp.eq.s32.totalorder %s1640_s21, 0  ;;  %v1302_v56 = vpack.c.bf16 %v1943_v8, %v1931_v4  ;;  %s781_s22 = ssub.s32 3, %s1660_s11  ;;  %s1660_s11 = sphi %s2201_s11, %s777_s11   ;;  %v1656_v44 = vphi %v2199_v44, %v968_v44   ;;  %v1652_v46 = vphi %v2197_v46, %v969_v46  }
 0x1a4   : >> { %v1304_v47 = vpack.c.bf16 %v1940_v7, %v1928_v3  ;;  %v1276_v43 = vpack.c.bf16 %v1958_v13, %v1946_v9  ;;  %v1306_v50 = vpack.c.bf16 %v1967_v16, %v1955_v12  ;;  %v1278_v60 = vpack.c.bf16 %v1985_v22, %v1973_v18 }
 0x1a5   : >> { %1271 = vmatprep.subr.bf16.mxu0 %v1270_v51  ;;  %1303 = vmatprep.subr.bf16.mxu1 %v1302_v56  ;;  %v1308_v59 = vpack.c.bf16 %v1964_v15, %v1952_v11  ;;  %s2233_s28 = scalar_select %p780_p9, %s1660_s11, %s781_s22  ;;  %v1310_v53 = vpack.c.bf16 %v1991_v24, %v1979_v20  ;;  %v1670_v61 = vmov 0.0   ;;  %v1280_v63 = vpack.c.bf16 %v1982_v21, %v1970_v17  ;;  %v2424_v56 = vld [vmem:[#allocation18_spill] sm:$0xff] }
 0x1a6   : >> { %1273 = vmatpush1.bf16.msra.mxu0 %v1272_v62  ;;  %1305 = vmatpush1.bf16.msra.mxu1 %v1304_v47  ;;  %v1282_v41 = vpack.c.bf16 %v2009_v30, %v1997_v26  ;;  %v1312_v48 = vpack.c.bf16 %v1988_v23, %v1976_v19  ;;  %v1671_v54 = vmov 0   ;;  %v1314_v55 = vpack.c.bf16 %v2015_v32, %v2003_v28  ;;  %v2423_v62 = vld [vmem:[#allocation24_spill] sm:$0xff]  ;;  %v2425_v47 = vld [vmem:[#allocation19_spill] sm:$0xff]  ;;  %s777_s11 = sadd.s32 1, %s1660_s11  }
 0x1a7   : >> { %1275 = vmatprep.subr.bf16.mxu0 %v1274_v52  ;;  %1307 = vmatprep.subr.bf16.mxu1 %v1306_v50  ;;  %v961_v58 = vstv %s2233_s28  ;;  %v1284_v49 = vpack.c.bf16 %v2006_v29, %v1994_v25  ;;  %v1286_v0 = vpack.c.bf16 %v2033_v38, %v2021_v34  ;;  %v1316_v39 = vpack.c.bf16 %v2012_v31, %v2000_v27  ;;  %v2426_v50 = vld [vmem:[#allocation22_spill] sm:$0xff]  ;;  %s1205_s17 = sshll.u32 %s2233_s28, 5  ;;  %s1198_s9 = sshll.u32 %s2233_s28, 3 }
 0x1a8   : >> { %855 = vmatprep.mubr.f32.mxu0 %v1670_v61  ;;  %926 = vmatprep.mubr.f32.mxu1 %v1670_v61  ;;  %vm962_vm0 = vcmp.lt.s32.totalorder %v961_v58, %v2116_v57  ;;  %v1318_v35 = vpack.c.bf16 %v2039_v40, %v2027_v36  ;;  %v1288_v51 = vpack.c.bf16 %v2030_v37, %v2018_v33  ;;  %v2429_v61 = vld [vmem:[#allocation23_spill] sm:$0xff]  ;;  %v2432_v58 = vld [vmem:[#allocation21_spill] sm:$0xff]  ;;  %s786_s25 = scalar_lea.vmem [#allocation2], %s1205_s17  ;;  %s972_s26 = scalar_lea.vmem %s2195_s15, %s1198_s9 [#allocation11] }
 0x1a9   : >> { %1445 = vset.pattern.permute.xlu0 %v1671_v54  ;;  %v963_v45 = vsel %vm962_vm0, 1, %v1671_v54  ;;  %v1290_v52 = vpack.c.bf16 %v2423_v62, %v2045_v42  ;;  %v2437_v62 = vld [vmem:[#allocation31_spill] sm:$0xff]  ;;  %p774_p7 = scmp.ge.s32.totalorder %s777_s11, 4  }
 0x1aa   : >> { %1277 = vmatpush1.bf16.msra.mxu0 %v1276_v43  ;;  %1309 = vmatpush1.bf16.msra.mxu1 %v1308_v59  ;;  %v1320_v43 = vpack.c.bf16 %v2425_v47, %v2424_v56  ;;  %v2439_v47 = vld [vmem:[#allocation40_spill] sm:$0xff]  ;;  %s1200_s29 = sshll.u32 (%p774_p7), %s1640_s21, 7  ;;  %s998_s27 = sshll.u32 (%p774_p7), %s2195_s15, 4  ;;  %s2305_s27 = int_to_ptr.vmem [resolvable:$true] %s998_s27 }
 0x1ab   : >> { %1279 = vmatprep.subr.bf16.mxu0 %v1278_v60  ;;  %1311 = vmatprep.subr.bf16.mxu1 %v1310_v53  ;;  %v2427_v60 = vld [vmem:[#allocation26_spill] sm:$0xff]  ;;  %v2428_v53 = vld [vmem:[#allocation20_spill] sm:$0xff]  ;;  %s2302_s30 = scalar_lea.hbm (%p774_p7), %s2359_s5, %s1200_s29  ;;  %s977_s10 = scalar_lea.sflag (%p774_p7), [#allocation7], %s1907_s16 }
 0x1ac   : >> { %965 = vperm.xlu0 %1445, %v963_v45   ;;  %v1322_v59 = vpack.c.bf16 %v2427_v60, %v2426_v50  ;;  %v2434_v45 = vld [vmem:[#allocation30_spill] sm:$0xff]  ;;  %v2440_v50 = vld [vmem:[#allocation29_spill] sm:$0xff]  ;;  %s1550_s14 = scalar_lea.vmem (%p774_p7), %s2305_s27, 512  ;;  %p2448_p13 = scmp.ne.s32.totalorder (%p774_p7), %s2379_s6, 0 }
 0x1ad   : >> { %v2441_v60 = vld [vmem:[#allocation33_spill] sm:$0xff]  ;;  %p1551_p12 = scmp.ne.s32.totalorder (%p774_p7), %s2305_s27, %s1550_s14  ;;  %s1672_s13 = smov (%p774_p7), [#allocation11]  }
 0x1ae   : >> { %1281 = vmatpush1.bf16.msra.mxu0 %v1280_v63  ;;  %1313 = vmatpush1.bf16.msra.mxu1 %v1312_v48  ;;  %v1292_v63 = vpack.c.bf16 %v2429_v61, %v2428_v53  ;;  %v2431_v48 = vld [vmem:[#allocation32_spill] sm:$0xff]  ;;  %v2442_v53 = vld [vmem:[#allocation38_spill] sm:$0xff]  ;;  %s1554_s12 = sshll.u32 (%p774_p7), %s1672_s13, 4  ;;  %s1555_s12 = int_to_ptr.vmem [resolvable:$false] %s1554_s12 }
 0x1af   : >> { %1283 = vmatprep.subr.bf16.mxu0 %v1282_v41  ;;  %1315 = vmatprep.subr.bf16.mxu1 %v1314_v55  ;;  %v2430_v41 = vld [vmem:[#allocation28_spill] sm:$0xff]  ;;  %v2433_v55 = vld [vmem:[#allocation25_spill] sm:$0xff]  ;;  %v2443_v61 = vld [vmem:[#allocation42_spill] sm:$0xff]  ;;  %p1552_p1 = pnand (%p774_p7), %p1551_p12, %p2448_p13  ;;  %s1556_s21 = scalar_lea.vmem (%p774_p7), %s1555_s12, 1024 }
 0x1b0   : >> { %v1294_v54 = vpack.c.bf16 %v2431_v48, %v2430_v41  ;;  %v2444_v41 = vld [vmem:[#allocation35_spill] sm:$0xff]  ;;  %p1557_p8 = scmp.lt.s32.totalorder (%p774_p7), %s2305_s27, %s1555_s12  ;;  %p1558_p0 = scmp.lt.s32.totalorder (%p774_p7), %s1556_s21, %s1550_s14 }
 0x1b1   : >> { %v2445_v48 = vld [vmem:[#allocation39_spill] sm:$0xff]  ;;  %p1553_p4 = pneg (%p774_p7), %p1552_p1 }
 0x1b2   : >> { %1285 = vmatpush1.bf16.msra.mxu0 %v1284_v49  ;;  %1317 = vmatpush1.bf16.msra.mxu1 %v1316_v39  ;;  %v1324_v49 = vpack.c.bf16 %v2433_v55, %v2432_v58  ;;  %v2446_v58 = vld [vmem:[#allocation37_spill] sm:$0xff]  ;;  %p1559_p11 = por (%p774_p7), %p1558_p0, %p1557_p8 }
 0x1b3   : >> { %1287 = vmatprep.subr.bf16.mxu0 %v1286_v0  ;;  %1319 = vmatprep.subr.bf16.mxu1 %v1318_v35  ;;  %v2435_v0 = vld [vmem:[#allocation34_spill] sm:$0xff]  ;;  %v2436_v35 = vld [vmem:[#allocation27_spill] sm:$0xff] }
 0x1b4   : >> { %v1326_v39 = vpack.c.bf16 %v2435_v0, %v2434_v45  ;;  %v1296_v56 = vpack.c.bf16 %v2437_v62, %v2436_v35  ;;  %v788_v45 = vld [vmem:[%s786_s25 + $0x8] sm:$0xff]  ;;  %p1560_p3 = pnand (%p774_p7), %p1559_p11, %p1553_p4 }
 0x1b6   : >> { %1289 = vmatpush1.bf16.msra.mxu0 %v1288_v51  ;;  %1321 = vmatpush1.bf16.msra.mxu1 %v1320_v43  ;;  %v2438_v51 = vld [vmem:[#allocation36_spill] sm:$0xff]  ;;  %v1328_v43 = vpack.c.bf16 %v2441_v60, %v2440_v50 }
 0x1b7   : >> { %1291 = vmatprep.subr.bf16.mxu0 %v1290_v52  ;;  %1323 = vmatprep.subr.bf16.mxu1 %v1322_v59  ;;  %v1298_v52 = vpack.c.bf16 %v2439_v47, %v2438_v51  ;;  %v1330_v59 = vpack.c.bf16 %v2443_v61, %v2442_v53  ;;  %v789_v50 = vld [vmem:[%s786_s25 + $0x10] sm:$0xff] }
 0x1ba   : >> { %1293 = vmatpush1.bf16.msra.mxu0 %v1292_v63  ;;  %1325 = vmatpush1.bf16.msra.mxu1 %v1324_v49  ;;  %v1300_v63 = vpack.c.bf16 %v2445_v48, %v2444_v41  ;;  %v787_v49 = vld [vmem:[%s786_s25] sm:$0xff] }
 0x1bb   : >> { %1295 = vmatprep.subr.bf16.mxu0 %v1294_v54  ;;  %1327 = vmatprep.subr.bf16.mxu1 %v1326_v39  ;;  %v2447_v54 = vld [vmem:[#allocation41_spill] sm:$0xff] }
 0x1bc   : >> { %v1332_v55 = vpack.c.bf16 %v2447_v54, %v2446_v58 }
 0x1be   : >> { %1297 = vmatpush1.bf16.msra.mxu0 %v1296_v56  ;;  %1329 = vmatpush1.bf16.msra.mxu1 %v1328_v43  ;;  %v790_v43 = vld [vmem:[%s786_s25 + $0x18] sm:$0xff] }
 0x1bf   : >> { %1299 = vmatprep.subr.bf16.mxu0 %v1298_v52  ;;  %1331 = vmatprep.subr.bf16.mxu1 %v1330_v59 }
 0x1c2   : >> { %1301 = vmatpush1.bf16.msra.mxu0 %v1300_v63  ;;  %1333 = vmatpush1.bf16.msra.mxu1 %v1332_v55 }
 0x1c5   : >> { %856 = vmatmul.mubr.f32.vlgmr.msra.gmra.mrb[0].mxu0 %v1656_v44  ;;  %927 = vmatmul.mubr.f32.vlgmr.msra.gmra.mrb[0].mxu1 %v1656_v44 }
 0x298   : >> { %v857_v0 = vpop.f32.mrb[0].mxu0  ;;  %v928_v56 = vpop.f32.mrb[0].mxu1 }
 0x299   : >> { %v933_v39 = vadd.f32 %v857_v0, %v787_v49  ;;  %v859_v35 = vpop.f32.mrb[1].mxu0  ;;  %v930_v47 = vpop.f32.mrb[1].mxu1  ;;  %v935_v60 = vadd.f32 %v928_v56, %v789_v50 }
 0x29a   : >> { %v934_v62 = vadd.f32 %v859_v35, %v788_v45  ;;  %v936_v61 = vadd.f32 %v930_v47, %v790_v43  ;;  %v966_v45 = vpop.permute.xlu0 %965 }
 0x29b   : >> { %v1195_v51 = vmul.f32 -1.442695, %v933_v39  ;;  %v1197_v53 = vmul.f32 -1.442695, %v935_v60  ;;  %vm967_vm1 = vcmp.eq.s32.totalorder %v966_v45, 1 }
 0x29c   : >> { %v1196_v52 = vmul.f32 -1.442695, %v934_v62 }
 0x29d   : >> { %1446 = vpow2.f32 %v1195_v51 }
 0x29e   : >> { %1448 = vpow2.f32 %v1196_v52 }
 0x29f   : >> { %1450 = vpow2.f32 %v1197_v53 }
 0x2a0   : >> { %1452 = vtanh.f32 %v936_v61 }
 0x2a7   : >> { %v1447_v59 = vpop.eup %1446 }
 0x2a8   : >> { %v1449_v41 = vpop.eup %1448  ;;  %v946_v48 = vadd.f32 1.0, %v1447_v59 }
 0x2a9   : >> { %v947_v63 = vadd.f32 1.0, %v1449_v41  ;;  %v1451_v58 = vpop.eup %1450 }
 0x2aa   : >> { %1454 = vrcp.f32 %v946_v48  ;;  %v1453_v54 = vpop.eup %1452  ;;  %v948_v49 = vadd.f32 1.0, %v1451_v58 }
 0x2ab   : >> { %1456 = vrcp.f32 %v947_v63 }
 0x2ac   : >> { %1458 = vrcp.f32 %v948_v49 }
 0x2b4   : >> { %v1455_v55 = vpop.eup %1454 }
 0x2b5   : >> { %v1457_v0 = vpop.eup %1456  ;;  %v957_v39 = vmul.f32 %v1455_v55, %v1453_v54 }
 0x2b6   : >> { %v956_v35 = vmul.f32 %v1652_v46, %v1457_v0  ;;  %v1459_v56 = vpop.eup %1458 }
 0x2b8   : >> { %v958_v62 = vadd.f32 %v957_v39, %v956_v35 }
 0x2ba   : >> { %1460 = vtanh.f32 %v958_v62  ;;  %v969_v46 = vsel %vm967_vm1, %v958_v62, %v1652_v46  }
 0x2c2   : > { %776 = sbr.rel (!%p774_p7) target bundleno = 419 (0x1a3), region = 128 }
 0x2c4   : >> { %v1461_v51 = vpop.eup %1460 }
 0x2c5   : >> { %v960_v47 = vmul.f32 %v1461_v51, %v1459_v56 }
 0x2c7   : >> { %v968_v44 = vsel %vm967_vm1, %v960_v47, %v1656_v44   ;;  %v970_v52 = vsel %vm967_vm1, %v960_v47, 0.0 }
 0x2c8   : >> { %973 = vst [vmem:[%s972_s26] sm:$0xff] %v970_v52 }
 0x2c9   : > { %1563 = shalt.err (!%p1560_p3)
}
 0x2ca   : > { %s1564_s7 = scalar_lea.hbm %s2302_s30, 512  ;;  %s1568_s22 = scalar_lea.hbm %s2359_s5, 1024 }
 0x2cb   : > { %p1565_p10 = scmp.ne.s32.totalorder %s2302_s30, %s1564_s7  ;;  %p1569_p2 = scmp.lt.u32.totalorder %s2302_s30, %s2359_s5 }
 0x2cc   : > { %p1570_p9 = scmp.lt.u32.totalorder %s1568_s22, %s1564_s7  ;;  %p1572_p12 = scmp.lt.u32.totalorder %s1564_s7, %s2302_s30 }
 0x2cd   : > { %p1566_p5 = pnand %p1565_p10, %p2448_p13 }
 0x2ce   : > { %p1571_p7 = por %p1570_p9, %p1569_p2 }
 0x2cf   : > { %p1567_p6 = pneg %p1566_p5 }
 0x2d0   : > { %p1573_p1 = por %p1572_p12, %p1571_p7 }
 0x2d2   : > { %p1574_p4 = pnand %p1573_p1, %p1567_p6 }
 0x2d4   : > { %1577 = shalt.err (!%p1574_p4)
}
 0x2d5   : > { %s1673_s25 = smov 128   ;;  %s1674_s9 = smov 256  }
 0x2d6   : > { %s1675_s26 = smov 8  }
 0x2d7   : > { %1342 = dma.vmem_to_hbm [thread:$0]  (%p2448_p13), %s2305_s27, 512, %s2302_s30, %s977_s10, %s1673_s25, %s1674_s9, %s1675_s26  }
 0x2d8 PF: > { %s1013_s29 = sand.u32 1, %s1628_s18   ;;  %p2449_p8 = scmp.ne.s32.totalorder %s2381_s8, 0 }
 0x2d9   : > { %p2450_p0 = scmp.ge.s32.totalorder %s1648_s23, 2  ;;  %s1014_s2 = scalar_lea.sflag [#allocation7], %s1013_s29 }
 0x2db   : > { %p1355_p11 = pnand %p2450_p0, %p2449_p8 }
 0x2dd   : > { %1623 = dma.done.wait (!%p1355_p11), %s1014_s2, 512  }
 0x2de   : > { %1625 = vsyncadd (!%p1355_p11), %s1014_s2, 4294966784  ;;  %s24_s23 = sadd.s32 1, %s1648_s23   ;;  %s2451_s24 = sld [smem:[#allocation17_spill]] }
 0x2df   : > { %p21_p3 = scmp.ge.s32.totalorder %s24_s23, 4   ;;  %s2452_s21 = sld [smem:[#allocation15_spill]] }
 0x2e0   : > { %s2453_s22 = sld [smem:[#allocation16_spill]]  ;;  %s2454_s18 = smov %s1632_s19 }
 0x2e1   : > { %s2455_s19 = smov %s1636_s20  ;;  %23 = sbr.rel (!%p21_p3) target bundleno = 10 (0xa), region = 139 }
 0x2e4   : > { %s2456_s20 = smov %s2451_s24 }
 0x2e8   :  { %1019 = vsyncpa [#allocation6], 1 }
 0x2e9   :  { %1021 = vsyncpa [#allocation6 + $0x1], 1 }
 0x2ea   :  { %1022 = vsyncpa [#allocation9], 1 }
 0x2eb   :  { %1024 = vsyncpa [#allocation9 + $0x1], 1 }
 0x2ec   :  { %1025 = vsyncpa [#allocation7], 1 }
 0x2ed   :  { %1027 = vsyncpa [#allocation7 + $0x1], 1 }

</bundles_post_ra>
